<compile_context>
chip_gen: v7x
topology: tpu7x:2x2x1
jax: 0.10.0
libtpu: 0.0.40
codegen_flags: <defaults>
</compile_context>

<pallas_src>
import functools

import jax
import jax.numpy as jnp
from jax import lax
from jax.experimental import pallas as pl
from jax.experimental.pallas import tpu as pltpu


def _round_up(x, m):
    return ((x + m - 1) // m) * m


def _has_bf16_vpu():
    """v6e / v7x have bf16 VALU+EUP; v5e and older do not."""
    try:
        kind = jax.devices()[0].device_kind.lower()
    except Exception:  # pragma: no cover - conservative fallback
        return False
    return not any(v in kind for v in ("v2", "v3", "v4", "v5"))


def _pick_compute_dtype(in_dtype):
    if jnp.dtype(in_dtype) == jnp.dtype(jnp.bfloat16) and _has_bf16_vpu():
        return jnp.bfloat16
    return jnp.float32


def _vmem_limit_bytes():
    try:
        phys = int(pltpu.get_tpu_info().vmem_capacity_bytes)
    except Exception:  # pragma: no cover - conservative fallback (v7x-sized)
        phys = 64 * 1024 * 1024
    # Half the physical VMEM, clamped to [16 MiB, 64 MiB] -> works on v5e/v6e/v7x.
    return min(max(phys // 2, 16 * 1024 * 1024), 64 * 1024 * 1024)


def _triplet_kernel(q_ref, p_ref, n_ref, o_ref, *, margin, distance, total_rows,
                    block_rows, needs_mask, reduce_in_kernel, compute_dtype):
    i = pl.program_id(0)
    cdt = compute_dtype

    # Elementwise math in `cdt` (bf16 on v6e/v7x for bf16 inputs, else f32);
    # `.astype` is a no-op when the input dtype already matches.
    q = q_ref[...].astype(cdt)
    p = p_ref[...].astype(cdt)
    n = n_ref[...].astype(cdt)

    def rowsum(x):
        # Row reduction with f32 accumulation (streaming cast, no full-tile
        # f32 temporary); keepdims keeps the natural (sublane, 1) layout.
        return jnp.sum(x, axis=-1, keepdims=True, dtype=jnp.float32)

    if distance == "l2-norm":
        # F.pairwise_distance(x1, x2, p=2, eps=1e-6) == || x1 - x2 + eps ||_2
        eps = jnp.asarray(1e-6, dtype=cdt)
        dp = q - p + eps
        dn = q - n + eps
        dist_p = jnp.sqrt(rowsum(dp * dp))
        dist_n = jnp.sqrt(rowsum(dn * dn))
        losses = jnp.maximum(dist_p - dist_n + margin, 0.0)
    elif distance == "cosine":
        # F.cosine_similarity: dot / max(||a|| * ||b||, eps)  (clamp the product)
        eps = 1e-8
        q2 = rowsum(q * q)
        p2 = rowsum(p * p)
        n2 = rowsum(n * n)
        qp = rowsum(q * p)
        qn = rowsum(q * n)
        # 1 / max(sqrt(q2*p2), eps) == rsqrt(max(q2*p2, eps^2)); rsqrt -> EUP slot
        cos_p = qp * lax.rsqrt(jnp.maximum(q2 * p2, eps * eps))
        cos_n = qn * lax.rsqrt(jnp.maximum(q2 * n2, eps * eps))
        losses = jnp.maximum(-cos_p + cos_n + margin, 0.0)
    elif distance == "dot":
        # torch.bmm(q.view(B,1,D), x.view(B,D,1)) == per-row dot product
        qp = rowsum(q * p)
        qn = rowsum(q * n)
        losses = jnp.maximum(-qp + qn + margin, 0.0)
    else:
        raise TypeError(f"Unrecognized option for `distance`:{distance}")

    if needs_mask:
        # Select (not multiply): stale/NaN rows of a partial last tile cannot
        # leak into the partial sum.
        row = i * block_rows + lax.broadcasted_iota(jnp.int32, losses.shape, 0)
        losses = jnp.where(row < total_rows, losses, 0.0)

    if reduce_in_kernel:
        # One scalar partial sum per tile -> (1, 1, 1) output block.
        o_ref[...] = jnp.sum(losses, axis=0, keepdims=True)[None]
    else:
        o_ref[...] = losses  # (tb, 1) per-row losses (ragged tail is clipped)


def triplet_loss(query, positive, negative, *, margin=1.0, distance="l2-norm",
                 reduction="mean", block_rows=None, compute_dtype=None):
    assert query.shape == positive.shape == negative.shape
    assert query.dtype == positive.dtype == negative.dtype
    if reduction not in ("mean", "sum", "none"):
        raise TypeError(f"Unrecognized option for `reduction`:{reduction}")
    if distance not in ("l2-norm", "cosine", "dot"):
        raise TypeError(f"Unrecognized option for `distance`:{distance}")

    B, D = query.shape
    in_itemsize = jnp.dtype(query.dtype).itemsize
    sublane = {4: 8, 2: 16, 1: 32}.get(in_itemsize, 8)

    cdt = _pick_compute_dtype(query.dtype) if compute_dtype is None else compute_dtype
    c_itemsize = jnp.dtype(cdt).itemsize

    vmem_limit = _vmem_limit_bytes()
    # Working set per batch row:
    #   3 inputs x 2 pipeline buffers at input dtype  (BlockSpec double-buffer)
    # + ~4 full-tile compute temporaries at the compute dtype (diffs/products).
    per_row = 6 * D * in_itemsize + 4 * D * c_itemsize
    if block_rows is None:
        tb = int(vmem_limit * 0.6) // max(per_row, 1)
        tb = max(sublane, min(512, tb))          # 512-row cap: v7x headroom
    else:
        tb = int(block_rows)
    tb = _round_up(max(tb, sublane), sublane)
    tb = min(tb, _round_up(B, sublane))
    num_tiles = pl.cdiv(B, tb)
    padded_b = num_tiles * tb
    needs_mask = padded_b != B
    reduce_in_kernel = reduction in ("mean", "sum")
    # Safety margin in case the working set at the chosen tile exceeds the cap.
    vmem_limit = min(128 * 1024 * 1024, max(vmem_limit, 2 * tb * per_row))

    kernel = functools.partial(
        _triplet_kernel, margin=margin, distance=distance, total_rows=B,
        block_rows=tb, needs_mask=needs_mask,
        reduce_in_kernel=reduce_in_kernel, compute_dtype=cdt)

    in_spec = pl.BlockSpec((tb, D), lambda i: (i, 0))
    if reduce_in_kernel:
        # Per-tile partial sums; last two block dims equal the array dims, the
        # tile index lives on the leading axis -> layout-legal (1,1,1) blocks.
        out_shape = jax.ShapeDtypeStruct((num_tiles, 1, 1), jnp.float32)
        out_spec = pl.BlockSpec((1, 1, 1), lambda i: (i, 0, 0))
        out_bytes = num_tiles * 4
    else:
        # Un-padded per-row output; Pallas clips the ragged last block's store.
        out_shape = jax.ShapeDtypeStruct((B, 1), jnp.float32)
        out_spec = pl.BlockSpec((tb, 1), lambda i: (i, 0))
        out_bytes = B * 4

    # Advisory cost estimate: purely bandwidth-bound custom call.
    flops = 10 * B * D
    transcendentals = 2 * B if distance in ("l2-norm", "cosine") else 0
    bytes_accessed = 3 * B * D * in_itemsize + out_bytes

    out = pl.pallas_call(
        kernel,
        out_shape=out_shape,
        grid_spec=pltpu.PrefetchScalarGridSpec(
            num_scalar_prefetch=0,
            grid=(num_tiles,),
            in_specs=[in_spec, in_spec, in_spec],
            out_specs=out_spec,
        ),
        compiler_params=pltpu.CompilerParams(
            dimension_semantics=("parallel",),
            vmem_limit_bytes=int(vmem_limit),
        ),
        cost_estimate=pl.CostEstimate(
            flops=flops, transcendentals=transcendentals,
            bytes_accessed=bytes_accessed),
    )(query, positive, negative)

    if reduction == "mean":
        return jnp.sum(out) / jnp.float32(B)
    if reduction == "sum":
        return jnp.sum(out)
    return out[:, 0]                              # (B,), matches torch 'none'


# ---------------------------------------------------------------------------
# Pure-JAX reference (mirrors the PyTorch module semantics at f32; the
# compute_dtype knob lets the bf16 test compare like-for-like).
# ---------------------------------------------------------------------------
def triplet_loss_ref(query, positive, negative, *, margin=1.0,
                     distance="l2-norm", reduction="mean",
                     compute_dtype=jnp.float32):
    q = query.astype(compute_dtype)
    p = positive.astype(compute_dtype)
    n = negative.astype(compute_dtype)

    def rowsum(x):
        return jnp.sum(x, axis=-1, dtype=jnp.float32)

    if distance == "l2-norm":
        eps = jnp.asarray(1e-6, dtype=compute_dtype)
        d_pos = jnp.sqrt(rowsum((q - p + eps) ** 2))
        d_neg = jnp.sqrt(rowsum((q - n + eps) ** 2))
        losses = jnp.maximum(d_pos - d_neg + margin, 0.0)
    elif distance == "cosine":
        eps = 1e-8
        def cos(a, b):
            num = rowsum(a * b)
            den = jnp.maximum(jnp.sqrt(rowsum(a * a)) * jnp.sqrt(rowsum(b * b)),
                              eps)
            return num / den
        losses = jnp.maximum(-cos(q, p) + cos(q, n) + margin, 0.0)
    else:  # dot
        d_pos = rowsum(q * p)
        d_neg = rowsum(q * n)
        losses = jnp.maximum(-d_pos + d_neg + margin, 0.0)
    if reduction == "mean":
        return jnp.mean(losses)
    if reduction == "sum":
        return jnp.sum(losses)
    return losses


if __name__ == "__main__":
    key = jax.random.PRNGKey(0)
    kq, kp, kn = jax.random.split(key, 3)

    # Small shapes consistent with the module (SPECTER embeddings, scaled down).
    B, D = 8, 128
    query = jax.random.normal(kq, (B, D), dtype=jnp.float32)
    positive = jax.random.normal(kp, (B, D), dtype=jnp.float32)
    negative = jax.random.normal(kn, (B, D), dtype=jnp.float32)

    # 1) default config: margin=1.0, distance='l2-norm', reduction='mean'
    out = jax.block_until_ready(triplet_loss(query, positive, negative))
    ref = triplet_loss_ref(query, positive, negative)
    assert jnp.allclose(out, ref, rtol=1e-4, atol=1e-4), (out, ref)

    # 2) multi-tile path with a ragged tail: exercises in-kernel per-tile
    #    partial sums, the tail mask, and pipelined (tb, D) blocks.
    B2, D2 = 300, 256
    q2 = jax.random.normal(kq, (B2, D2), dtype=jnp.float32)
    p2 = jax.random.normal(kp, (B2, D2), dtype=jnp.float32)
    n2 = jax.random.normal(kn, (B2, D2), dtype=jnp.float32)
    out2 = jax.block_until_ready(triplet_loss(q2, p2, n2, block_rows=128))
    ref2 = triplet_loss_ref(q2, p2, n2)
    assert jnp.allclose(out2, ref2, rtol=1e-4, atol=1e-4), (out2, ref2)

    # 3) cosine / sum (in-kernel reduction path)
    out3 = jax.block_until_ready(
        triplet_loss(query, positive, negative, distance="cosine",
                     reduction="sum"))
    ref3 = triplet_loss_ref(query, positive, negative, distance="cosine",
                            reduction="sum")
    assert jnp.allclose(out3, ref3, rtol=1e-4, atol=1e-4), (out3, ref3)

    # 4) dot / none with multiple tiles and a ragged tail (per-row output,
    #    un-padded (B,1) out_shape via ragged last-block handling).
    B4 = 20
    q4 = jax.random.normal(kq, (B4, D), dtype=jnp.float32)
    p4 = jax.random.normal(kp, (B4, D), dtype=jnp.float32)
    n4 = jax.random.normal(kn, (B4, D), dtype=jnp.float32)
    out4 = jax.block_until_ready(
        triplet_loss(q4, p4, n4, distance="dot", reduction="none",
                     block_rows=8))
    ref4 = triplet_loss_ref(q4, p4, n4, distance="dot", reduction="none")
    assert out4.shape == (B4,)
    assert jnp.allclose(out4, ref4, rtol=1e-4, atol=1e-4), (out4, ref4)

    # 5) bf16 ingest: elementwise math stays bf16 on v6e/v7x (f32 accumulation),
    #    f32 upcast on v5e and older; reference mirrors the same compute dtype.
    cdt = _pick_compute_dtype(jnp.bfloat16)
    qb = query.astype(jnp.bfloat16)
    pb = positive.astype(jnp.bfloat16)
    nb = negative.astype(jnp.bfloat16)
    out5 = jax.block_until_ready(triplet_loss(qb, pb, nb))
    ref5 = triplet_loss_ref(qb, pb, nb, compute_dtype=cdt)
    assert jnp.allclose(out5, ref5, rtol=2e-2, atol=2e-2), (out5, ref5)

    print("KERNEL_OK")
</pallas_src>

<mosaic_0001>
module attributes {stable_mosaic.version = 11 : i64} {
  func.func @_triplet_kernel(%arg0: i32, %arg1: memref<8x128xf32, #tpu.memory_space<vmem>>, %arg2: memref<8x128xf32, #tpu.memory_space<vmem>>, %arg3: memref<8x128xf32, #tpu.memory_space<vmem>>, %arg4: memref<1x1x1xf32, #tpu.memory_space<vmem>>) attributes {dimension_semantics = [#tpu.dimension_semantics<parallel>], iteration_bounds = array<i64: 1>, scalar_prefetch = 0 : i64, scratch_operands = 0 : i64, tpu.core_type = #tpu.core_type<tc>, window_params = [{transform_indices = @transform_0, window_bounds = array<i64: 8, 128>}, {transform_indices = @transform_1, window_bounds = array<i64: 8, 128>}, {transform_indices = @transform_2, window_bounds = array<i64: 8, 128>}, {transform_indices = @transform_3, window_bounds = array<i64: 1, 1, 1>}]} {
    %c0 = arith.constant 0 : index
    %c0_0 = arith.constant 0 : index
    %0 = vector.load %arg1[%c0, %c0_0] : memref<8x128xf32, #tpu.memory_space<vmem>>, vector<8x128xf32>
    %c0_1 = arith.constant 0 : index
    %c0_2 = arith.constant 0 : index
    %1 = vector.load %arg2[%c0_1, %c0_2] : memref<8x128xf32, #tpu.memory_space<vmem>>, vector<8x128xf32>
    %c0_3 = arith.constant 0 : index
    %c0_4 = arith.constant 0 : index
    %2 = vector.load %arg3[%c0_3, %c0_4] : memref<8x128xf32, #tpu.memory_space<vmem>>, vector<8x128xf32>
    %3 = arith.subf %0, %1 : vector<8x128xf32>
    %cst = arith.constant 9.99999997E-7 : f32
    %4 = vector.broadcast %cst : f32 to vector<8x128xf32>
    %5 = arith.addf %3, %4 : vector<8x128xf32>
    %6 = arith.subf %0, %2 : vector<8x128xf32>
    %cst_5 = arith.constant 9.99999997E-7 : f32
    %7 = vector.broadcast %cst_5 : f32 to vector<8x128xf32>
    %8 = arith.addf %6, %7 : vector<8x128xf32>
    %9 = arith.mulf %5, %5 : vector<8x128xf32>
    %cst_6 = arith.constant dense<0.000000e+00> : vector<8xf32>
    %10 = vector.multi_reduction <add>, %9, %cst_6 [1] : vector<8x128xf32> to vector<8xf32>
    %11 = vector.shape_cast %10 : vector<8xf32> to vector<8x1xf32>
    %12 = math.sqrt %11 : vector<8x1xf32>
    %13 = arith.mulf %8, %8 : vector<8x128xf32>
    %cst_7 = arith.constant dense<0.000000e+00> : vector<8xf32>
    %14 = vector.multi_reduction <add>, %13, %cst_7 [1] : vector<8x128xf32> to vector<8xf32>
    %15 = vector.shape_cast %14 : vector<8xf32> to vector<8x1xf32>
    %16 = math.sqrt %15 : vector<8x1xf32>
    %17 = arith.subf %12, %16 : vector<8x1xf32>
    %cst_8 = arith.constant 1.000000e+00 : f32
    %18 = vector.broadcast %cst_8 : f32 to vector<8x1xf32>
    %19 = arith.addf %17, %18 : vector<8x1xf32>
    %cst_9 = arith.constant 0.000000e+00 : f32
    %20 = vector.broadcast %cst_9 : f32 to vector<8x1xf32>
    %21 = arith.maximumf %19, %20 : vector<8x1xf32>
    %cst_10 = arith.constant dense<0.000000e+00> : vector<1xf32>
    %22 = vector.multi_reduction <add>, %21, %cst_10 [0] : vector<8x1xf32> to vector<1xf32>
    %23 = vector.shape_cast %22 : vector<1xf32> to vector<1x1xf32>
    %24 = vector.shape_cast %23 : vector<1x1xf32> to vector<1x1x1xf32>
    %c0_11 = arith.constant 0 : index
    %c0_12 = arith.constant 0 : index
    %c0_13 = arith.constant 0 : index
    %25 = vector.load %arg4[%c0_11, %c0_12, %c0_13] : memref<1x1x1xf32, #tpu.memory_space<vmem>>, vector<1x1x1xf32>
    tpu.vector_store %arg4[%c0_11, %c0_12, %c0_13], %24 {strides = array<i32>} : memref<1x1x1xf32, #tpu.memory_space<vmem>>, vector<1x1x1xf32>,
    return
  }
  func.func @transform_0(%arg0: i32) -> (i32, i32) {
    %c0_i32 = arith.constant 0 : i32
    %c0_i32_0 = arith.constant 0 : i32
    return %arg0, %c0_i32 : i32, i32
  }
  func.func @transform_1(%arg0: i32) -> (i32, i32) {
    %c0_i32 = arith.constant 0 : i32
    %c0_i32_0 = arith.constant 0 : i32
    return %arg0, %c0_i32 : i32, i32
  }
  func.func @transform_2(%arg0: i32) -> (i32, i32) {
    %c0_i32 = arith.constant 0 : i32
    %c0_i32_0 = arith.constant 0 : i32
    return %arg0, %c0_i32 : i32, i32
  }
  func.func @transform_3(%arg0: i32) -> (i32, i32, i32) {
    %c0_i32 = arith.constant 0 : i32
    %c0_i32_0 = arith.constant 0 : i32
    %c0_i32_1 = arith.constant 0 : i32
    return %arg0, %c0_i32, %c0_i32_0 : i32, i32, i32
  }
}

</mosaic_0001>

<bundles_post_ra>
// kernel: tpu_custom_call.1
= control target key start
LH: loop header
LB: loop body
LE: loop exit
PB: predicated region body
PF: predicated region fallthrough
CT: control target
= control target key end

     0   :  { %8 = vsyncpa [#allocation3], 0  ;;  %s278_s0 = inlined_call_operand.hbm [shape: f32[8,128], index: 0, kind: input, shape index: {}]   ;;  %s279_s1 = inlined_call_operand.hbm [shape: f32[8,128], index: 1, kind: input, shape index: {}]   ;;  %s280_s2 = inlined_call_operand.hbm [shape: f32[8,128], index: 2, kind: input, shape index: {}]   ;;  %s281_s3 = inlined_call_operand.hbm [shape: f32[1,1,1], index: 3, kind: output, shape index: {}]  }
   0x1   :  { %9 = vsyncpa [#allocation6], 0 }
   0x2   :  { %10 = vsyncpa [#allocation4], 0  ;;  %s206_s12 = smov [#allocation5]   ;;  %s207_s14 = smov [#allocation2]  }
   0x3   :  { %s27_s13 = sshll.u32 %s206_s12, 4  ;;  %s17_s15 = sshll.u32 %s207_s14, 4  ;;  %s28_s13 = int_to_ptr.vmem [resolvable:$true] %s27_s13  ;;  %s18_s15 = int_to_ptr.vmem [resolvable:$true] %s17_s15 }
   0x4   :  { %s112_s18 = scalar_lea.hbm %s279_s1, 128 }
   0x5   :  { %p113_p0 = scmp.ne.s32.totalorder %s279_s1, %s112_s18  ;;  %p116_p1 = scmp.lt.u32.totalorder %s112_s18, %s279_s1 }
   0x7   :  { %p118_p2 = pnand %p116_p1, %p113_p0 }
   0x9   :  { %121 = shalt.err (!%p118_p2)
}
   0xa   :  { %s122_s23 = scalar_lea.vmem %s28_s13, 128  ;;  %p127_p4 = scmp.lt.s32.totalorder %s28_s13, %s28_s13 }
   0xb   :  { %p123_p3 = scmp.ne.s32.totalorder %s28_s13, %s122_s23  ;;  %p128_p5 = scmp.lt.s32.totalorder %s122_s23, %s122_s23 }
   0xd   :  { %p129_p6 = por %p128_p5, %p127_p4 }
   0xf   :  { %p130_p7 = pnand %p129_p6, %p123_p3 }
  0x11   :  { %133 = shalt.err (!%p130_p7)
}
  0x12   :  { %30 = dma.hbm_to_vmem [thread:$0]  %s279_s1, 128, %s28_s13, [#allocation6]  }
  0x13   :  { %s134_s28 = scalar_lea.hbm %s278_s0, 128 }
  0x14   :  { %p135_p8 = scmp.ne.s32.totalorder %s278_s0, %s134_s28  ;;  %p138_p9 = scmp.lt.u32.totalorder %s134_s28, %s278_s0 }
  0x16   :  { %p140_p10 = pnand %p138_p9, %p135_p8 }
  0x18   :  { %143 = shalt.err (!%p140_p10)
}
  0x19   :  { %s144_s6 = scalar_lea.vmem %s18_s15, 128  ;;  %p149_p12 = scmp.lt.s32.totalorder %s18_s15, %s18_s15 }
  0x1a   :  { %p145_p11 = scmp.ne.s32.totalorder %s18_s15, %s144_s6  ;;  %p150_p13 = scmp.lt.s32.totalorder %s144_s6, %s144_s6 }
  0x1c   :  { %p151_p0 = por %p150_p13, %p149_p12 }
  0x1e   :  { %p152_p1 = pnand %p151_p0, %p145_p11 }
  0x20   :  { %155 = shalt.err (!%p152_p1)
}
  0x21   :  { %20 = dma.hbm_to_vmem [thread:$0]  %s278_s0, 128, %s18_s15, [#allocation3]  }
  0x22   :  { %s208_s8 = smov [#allocation7]   ;;  %s156_s12 = scalar_lea.hbm %s280_s2, 128 }
  0x23   :  { %s37_s9 = sshll.u32 %s208_s8, 4  ;;  %p157_p2 = scmp.ne.s32.totalorder %s280_s2, %s156_s12  ;;  %s38_s9 = int_to_ptr.vmem [resolvable:$true] %s37_s9 }
  0x24   :  { %p160_p3 = scmp.lt.u32.totalorder %s156_s12, %s280_s2 }
  0x26   :  { %p162_p4 = pnand %p160_p3, %p157_p2 }
  0x28   :  { %165 = shalt.err (!%p162_p4)
}
  0x29   :  { %s166_s18 = scalar_lea.vmem %s38_s9, 128  ;;  %p171_p6 = scmp.lt.s32.totalorder %s38_s9, %s38_s9 }
  0x2a   :  { %p167_p5 = scmp.ne.s32.totalorder %s38_s9, %s166_s18  ;;  %p172_p7 = scmp.lt.s32.totalorder %s166_s18, %s166_s18 }
  0x2c   :  { %p173_p8 = por %p172_p7, %p171_p6 }
  0x2e   :  { %p174_p9 = pnand %p173_p8, %p167_p5 }
  0x30   :  { %177 = shalt.err (!%p174_p9)
}
  0x31   :  { %40 = dma.hbm_to_vmem [thread:$0]  %s280_s2, 128, %s38_s9, [#allocation6]  }
  0x32   :  { %200 = dma.done.wait [#allocation3], 128  }
  0x33   :  { %201 = vsyncadd [#allocation3], 4294967168 }
  0x34   :  { %202 = dma.done.wait [#allocation6], 256  }
  0x35   :  { %203 = vsyncadd [#allocation6], 4294967040  ;;  %v50_v0 = vld [vmem:[#allocation2] sm:$0xff]  ;;  %v51_v1 = vld [vmem:[#allocation5] sm:$0xff]  ;;  %s209_s2 = smov [#allocation8]   ;;  %vm86_vm4 = vcmask 0  }
  0x36   :  { %v52_v2 = vld [vmem:[#allocation7] sm:$0xff]  ;;  %v53_v3 = vsub.f32 %v50_v0, %v51_v1  ;;  %s94_s19 = sshll.u32 %s209_s2, 4  ;;  %s95_s19 = int_to_ptr.vmem [resolvable:$true] %s94_s19 }
  0x37   :  { %v55_v4 = vsub.f32 %v50_v0, %v52_v2  ;;  %s178_s20 = scalar_lea.vmem %s95_s19, 16  ;;  %s182_s21 = scalar_lea.vmem %s95_s19, 32 }
  0x38   :  { %v54_v5 = vadd.f32 1e-06, %v53_v3  ;;  %p179_p10 = scmp.ne.s32.totalorder %s95_s19, %s178_s20  ;;  %p183_p11 = scmp.lt.s32.totalorder %s95_s19, %s95_s19 }
  0x39   :  { %v56_v6 = vadd.f32 1e-06, %v55_v4  ;;  %p184_p12 = scmp.lt.s32.totalorder %s182_s21, %s178_s20 }
  0x3a   :  { %v57_v7 = vmul.f32 %v54_v5, %v54_v5 }
  0x3b   :  { %v67_v8 = vmul.f32 %v56_v6, %v56_v6  ;;  %p185_p13 = por %p184_p12, %p183_p11 }
  0x3c   :  { %58 = vadd.xlane.f32.xlu0 %v57_v7 }
  0x3d   :  { %p186_p0 = pnand %p185_p13, %p179_p10 }
  0x40   :  { %68 = vadd.xlane.f32.xlu0 %v67_v8 }
  0xc9   :  { %v59_v9 = vpop.xlane.xlu0 %58 }
  0xca   :  { %108 = vrsqrt.f32 %v59_v9  ;;  %vm62_vm0 = vcmp.eq.f32.partialorder %v59_v9, inf  ;;  %v65_v16 = vand.u32 2147483648, %v59_v9  ;;  %vm64_vm2 = vcmp.eq.f32.partialorder %v59_v9, 0.0 }
  0xcd   :  { %v69_v10 = vpop.xlane.xlu0 %68 }
  0xce   :  { %110 = vrsqrt.f32 %v69_v10  ;;  %vm72_vm1 = vcmp.eq.f32.partialorder %v69_v10, inf  ;;  %v75_v17 = vand.u32 2147483648, %v69_v10  ;;  %vm74_vm3 = vcmp.eq.f32.partialorder %v69_v10, 0.0 }
  0xd4   :  { %v109_v11 = vpop.eup %108 }
  0xd5   :  { %v61_v12 = vmul.f32 %v109_v11, %v59_v9 }
  0xd7   :  { %v63_v14 = vsel %vm62_vm0, %v59_v9, %v61_v12 }
  0xd8   :  { %v111_v13 = vpop.eup %110  ;;  %v66_v19 = vsel %vm64_vm2, %v65_v16, %v63_v14 }
  0xd9   :  { %v71_v15 = vmul.f32 %v111_v13, %v69_v10 }
  0xdb   :  { %v73_v18 = vsel %vm72_vm1, %v69_v10, %v71_v15 }
  0xdc   :  { %v76_v20 = vsel %vm74_vm3, %v75_v17, %v73_v18 }
  0xdd   :  { %v77_v21 = vsub.f32 %v66_v19, %v76_v20 }
  0xdf   :  { %v78_v22 = vadd.f32 1.0, %v77_v21 }
  0xe1   :  { %v79_v23 = vmax.f32 %v78_v22, 0.0 }
  0xe3   :  { %v80_v24 = vrot.slane %v79_v23, 4 }
  0xe5   :  { %v81_v25 = vadd.f32 %v80_v24, %v79_v23 }
  0xe7   :  { %v82_v26 = vrot.slane %v81_v25, 2 }
  0xe9   :  { %v83_v27 = vadd.f32 %v82_v26, %v81_v25 }
  0xeb   :  { %v84_v28 = vrot.slane %v83_v27, 1 }
  0xed   :  { %v85_v29 = vadd.f32 %v84_v28, %v83_v27 }
  0xef   :  { %87 = vst.msk [vmem:[#allocation8] sm:$0x1] %vm86_vm4, %v85_v29 }
  0xf0   :  { %189 = shalt.err (!%p186_p0)
}
  0xf1   :  { %s190_s24 = scalar_lea.hbm %s281_s3, 16 }
  0xf2   :  { %p191_p1 = scmp.ne.s32.totalorder %s281_s3, %s190_s24  ;;  %p194_p2 = scmp.lt.u32.totalorder %s190_s24, %s281_s3 }
  0xf4   :  { %p196_p3 = pnand %p194_p2, %p191_p1 }
  0xf6   :  { %199 = shalt.err (!%p196_p3)
}
  0xf7   :  { %97 = dma.vmem_to_hbm [thread:$0]  %s95_s19, 16, %s281_s3, [#allocation4]  }
  0xf8   :  { %204 = dma.done.wait [#allocation4], 16  }
  0xf9   :  { %205 = vsyncadd [#allocation4], 4294967280 }
  0xfa   :  { %101 = vsyncpa [#allocation3], 1 }
  0xfb   :  { %102 = vsyncpa [#allocation6], 1 }
  0xfc   :  { %103 = vsyncpa [#allocation4], 1 }

</bundles_post_ra>
